<compile_context>
chip_gen: v6e
topology: v6e:2x2x1
jax: 0.10.0
libtpu: 0.0.40
codegen_flags: <defaults>
</compile_context>

<pallas_src>
import functools

import jax
import jax.numpy as jnp
from jax import lax
from jax.experimental import pallas as pl
from jax.experimental.pallas import tpu as pltpu


# ----------------------------- Pallas kernel --------------------------------

def _deconv_in_relu_kernel(t_ref, w_ref, b_ref, o_ref, *, inv_hw, eps):
    """Per image: 4 phase GEMMs (channel-major, lane-dense over H*W), fused
    InstanceNorm (biased variance, no affine) + ReLU, lane-dense stores.

    t_ref: (1, 4, 4*C_in, H*W)  phase tap matrices for this image
    w_ref: (4, C_out, 4*C_in)   per-phase weight matrices
    b_ref: (C_out, 1)           conv bias
    o_ref: (1, 4, C_out, H*W)   normalized+ReLU'd phase outputs
    """
    bias = b_ref[...]                                    # (C_out, 1)

    # Phase GEMMs on the MXU: (C_out, K) @ (K, H*W) -> (C_out, H*W), fp32 accumulate.
    ys = []
    for p in range(4):
        ys.append(
            jnp.dot(w_ref[p], t_ref[0, p], preferred_element_type=jnp.float32)
            + bias
        )

    # Instance-norm statistics over the full output spatial extent (all 4 phases).
    # Lane-axis reductions (spatial is on lanes) -> XLU, cheap.
    mean = sum(jnp.sum(y, axis=1, keepdims=True) for y in ys) * inv_hw       # (C_out, 1)
    var = sum(jnp.sum((y - mean) ** 2, axis=1, keepdims=True) for y in ys) * inv_hw
    inv_std = lax.rsqrt(var + eps)                                           # EUP

    for p in range(4):
        o_ref[0, p] = jnp.maximum((ys[p] - mean) * inv_std, 0.0)


# ------------------------------ JAX glue ------------------------------------

def _phase_weights(wt):
    """Rearrange the PyTorch ConvTranspose2d weight (C_in, C_out, 4, 4) into one
    (C_out, 4*C_in) matrix per output phase (oy%2, ox%2)."""
    phases = []
    for py in (0, 1):
        for px in (0, 1):
            blocks = []
            for dy in (0, 1):
                for dx in (0, 1):
                    ky = 3 - py - 2 * dy
                    kx = 3 - px - 2 * dx
                    blocks.append(wt[:, :, ky, kx].T)          # (C_out, C_in)
            phases.append(jnp.concatenate(blocks, axis=1))     # (C_out, 4*C_in)
    return jnp.stack(phases, axis=0)                           # (4, C_out, 4*C_in)


def _phase_taps(x_nchw):
    """Per phase, stack the 4 shifted input slices into a (4*C_in, H*W) tap matrix.
    Only ~4x the input is materialized (vs 16x/75%-zero for the naive im2col)."""
    n, c_in, h, w = x_nchw.shape
    xp = jnp.pad(x_nchw, ((0, 0), (0, 0), (1, 1), (1, 1)))     # zero border
    phases = []
    for py in (0, 1):
        for px in (0, 1):
            taps = []
            for dy in (0, 1):
                for dx in (0, 1):
                    taps.append(xp[:, :, py + dy:py + dy + h, px + dx:px + dx + w])
            phases.append(jnp.concatenate(taps, axis=1))       # (N, 4*C_in, H, W)
    taps = jnp.stack(phases, axis=1)                           # (N, 4, 4*C_in, H, W)
    return taps.reshape(n, 4, 4 * c_in, h * w)


def _fused_deconv_norm_relu(taps, w_all, bias2d, h, w, *, eps=1e-5):
    n, _, k4, hw = taps.shape
    c_out = w_all.shape[1]
    kern = functools.partial(_deconv_in_relu_kernel, inv_hw=1.0 / (4.0 * h * w), eps=eps)
    return pl.pallas_call(
        kern,
        out_shape=jax.ShapeDtypeStruct((n, 4, c_out, hw), jnp.float32),
        grid=(n,),
        in_specs=[
            pl.BlockSpec((1, 4, k4, hw), lambda i: (i, 0, 0, 0)),
            pl.BlockSpec((4, c_out, k4), lambda i: (0, 0, 0)),
            pl.BlockSpec((c_out, 1), lambda i: (0, 0)),
        ],
        out_specs=pl.BlockSpec((1, 4, c_out, hw), lambda i: (i, 0, 0, 0)),
        compiler_params=pltpu.CompilerParams(
            dimension_semantics=("parallel",),          # batch images are independent
            vmem_limit_bytes=48 * 1024 * 1024,          # headroom over default scoped VMEM
        ),
    )(taps, w_all, bias2d)


def unet_up_forward(x_nchw, skip_nchw, wt, bias, *, gemm_dtype=jnp.float32, eps=1e-5):
    """UNetUp.forward. x_nchw: (N, C_in, H, W); skip_nchw: (N, C_skip, 2H, 2W).
    wt: (C_in, C_out, 4, 4) PyTorch ConvTranspose2d weight; bias: (C_out,).
    gemm_dtype=jnp.bfloat16 gives ~3x MXU throughput on v5e/v6e (fp32 accumulation
    is kept inside the kernel); default f32 to keep the tight reference tolerance."""
    n, c_in, h, w = x_nchw.shape
    c_out = wt.shape[1]

    x = x_nchw.astype(jnp.float32)
    taps = _phase_taps(x).astype(gemm_dtype)                       # (N, 4, 4*C_in, H*W)
    w_all = _phase_weights(wt.astype(jnp.float32)).astype(gemm_dtype)
    bias2d = bias.astype(jnp.float32).reshape(c_out, 1)

    y = _fused_deconv_norm_relu(taps, w_all, bias2d, h, w, eps=eps)  # (N, 4, C_out, H*W)

    # Depth-to-space: interleave the 4 phase outputs back into NCHW (activation only;
    # the skip passthrough never touches the kernel).
    act = y.reshape(n, 2, 2, c_out, h, w)                 # (n, py, px, c, m, l)
    act = jnp.transpose(act, (0, 3, 4, 1, 5, 2))          # (n, c, m, py, l, px)
    act = act.reshape(n, c_out, 2 * h, 2 * w)

    return jnp.concatenate([act, skip_nchw.astype(jnp.float32)], axis=1)


# ------------------------- pure-JAX reference -------------------------------

def _reference(x_nchw, skip_nchw, wt, bias, eps=1e-5):
    w_conv = jnp.transpose(wt[:, :, ::-1, ::-1], (1, 0, 2, 3))     # (C_out, C_in, 4, 4)
    y = lax.conv_general_dilated(
        x_nchw.astype(jnp.float32), w_conv.astype(jnp.float32),
        window_strides=(1, 1), padding=((2, 2), (2, 2)), lhs_dilation=(2, 2),
        dimension_numbers=("NCHW", "OIHW", "NCHW"),
    ) + bias[None, :, None, None]
    mean = jnp.mean(y, axis=(2, 3), keepdims=True)
    var = jnp.mean((y - mean) ** 2, axis=(2, 3), keepdims=True)
    y = jnp.maximum((y - mean) * lax.rsqrt(var + eps), 0.0)
    return jnp.concatenate([y, skip_nchw.astype(jnp.float32)], axis=1)


# ---------------------------------- main -------------------------------------

if __name__ == "__main__":
    key = jax.random.PRNGKey(0)
    k_x, k_s, k_w, k_b = jax.random.split(key, 4)

    N, C_IN, H, W = 2, 4, 8, 8
    C_OUT = 8
    C_SKIP = 8           # skip feature map from the UNet down path

    x = jax.random.normal(k_x, (N, C_IN, H, W), dtype=jnp.float32)
    skip = jax.random.normal(k_s, (N, C_SKIP, 2 * H, 2 * W), dtype=jnp.float32)
    # Shapes match nn.ConvTranspose2d(C_IN, C_OUT, 4, 2, 1).
    wt = 0.1 * jax.random.normal(k_w, (C_IN, C_OUT, 4, 4), dtype=jnp.float32)
    bias = 0.1 * jax.random.normal(k_b, (C_OUT,), dtype=jnp.float32)

    fwd = jax.jit(unet_up_forward)
    out = jax.block_until_ready(fwd(x, skip, wt, bias))
    ref = jax.block_until_ready(_reference(x, skip, wt, bias))

    assert out.shape == (N, C_OUT + C_SKIP, 2 * H, 2 * W), out.shape
    assert jnp.allclose(out, ref, atol=2e-4, rtol=2e-4), float(jnp.max(jnp.abs(out - ref)))

    print("KERNEL_OK")
</pallas_src>

<mosaic_0001>
module attributes {stable_mosaic.version = 11 : i64} {
  func.func @_deconv_in_relu_kernel(%arg0: i32, %arg1: memref<1x4x16x64xf32, #tpu.memory_space<vmem>>, %arg2: memref<4x8x16xf32, #tpu.memory_space<vmem>>, %arg3: memref<8x1xf32, #tpu.memory_space<vmem>>, %arg4: memref<1x4x8x64xf32, #tpu.memory_space<vmem>>) attributes {dimension_semantics = [#tpu.dimension_semantics<parallel>], iteration_bounds = array<i64: 2>, scalar_prefetch = 0 : i64, scratch_operands = 0 : i64, tpu.core_type = #tpu.core_type<tc>, window_params = [{transform_indices = @transform_0, window_bounds = array<i64: 1, 4, 16, 64>}, {pipeline_mode = #tpu.pipeline_mode<synchronous>, transform_indices = @transform_1, window_bounds = array<i64: 4, 8, 16>}, {pipeline_mode = #tpu.pipeline_mode<synchronous>, transform_indices = @transform_2, window_bounds = array<i64: 8, 1>}, {transform_indices = @transform_3, window_bounds = array<i64: 1, 4, 8, 64>}]} {
    %c0 = arith.constant 0 : index
    %c0_0 = arith.constant 0 : index
    %0 = vector.load %arg3[%c0, %c0_0] : memref<8x1xf32, #tpu.memory_space<vmem>>, vector<8x1xf32>
    %c0_1 = arith.constant 0 : index
    %c0_2 = arith.constant 0 : index
    %c0_3 = arith.constant 0 : index
    %1 = vector.load %arg2[%c0_1, %c0_2, %c0_3] : memref<4x8x16xf32, #tpu.memory_space<vmem>>, vector<1x8x16xf32>
    %2 = vector.shape_cast %1 : vector<1x8x16xf32> to vector<8x16xf32>
    %c0_4 = arith.constant 0 : index
    %c0_5 = arith.constant 0 : index
    %c0_6 = arith.constant 0 : index
    %c0_7 = arith.constant 0 : index
    %3 = vector.load %arg1[%c0_4, %c0_5, %c0_6, %c0_7] : memref<1x4x16x64xf32, #tpu.memory_space<vmem>>, vector<1x1x16x64xf32>
    %4 = vector.shape_cast %3 : vector<1x1x16x64xf32> to vector<16x64xf32>
    %cst = arith.constant dense<0.000000e+00> : vector<8x64xf32>
    %5 = tpu.matmul %2, %4, %cst {dimension_numbers = #tpu.dot_dimension_numbers<[1], [0], [0], [1], [0, 0, 1, 1], [], []>} : vector<8x16xf32>, vector<16x64xf32>, vector<8x64xf32> -> vector<8x64xf32>
    %6 = vector.broadcast %0 : vector<8x1xf32> to vector<8x64xf32>
    %7 = arith.addf %5, %6 : vector<8x64xf32>
    %c1 = arith.constant 1 : index
    %c0_8 = arith.constant 0 : index
    %c0_9 = arith.constant 0 : index
    %8 = vector.load %arg2[%c1, %c0_8, %c0_9] : memref<4x8x16xf32, #tpu.memory_space<vmem>>, vector<1x8x16xf32>
    %9 = vector.shape_cast %8 : vector<1x8x16xf32> to vector<8x16xf32>
    %c0_10 = arith.constant 0 : index
    %c1_11 = arith.constant 1 : index
    %c0_12 = arith.constant 0 : index
    %c0_13 = arith.constant 0 : index
    %10 = vector.load %arg1[%c0_10, %c1_11, %c0_12, %c0_13] : memref<1x4x16x64xf32, #tpu.memory_space<vmem>>, vector<1x1x16x64xf32>
    %11 = vector.shape_cast %10 : vector<1x1x16x64xf32> to vector<16x64xf32>
    %cst_14 = arith.constant dense<0.000000e+00> : vector<8x64xf32>
    %12 = tpu.matmul %9, %11, %cst_14 {dimension_numbers = #tpu.dot_dimension_numbers<[1], [0], [0], [1], [0, 0, 1, 1], [], []>} : vector<8x16xf32>, vector<16x64xf32>, vector<8x64xf32> -> vector<8x64xf32>
    %13 = vector.broadcast %0 : vector<8x1xf32> to vector<8x64xf32>
    %14 = arith.addf %12, %13 : vector<8x64xf32>
    %c2 = arith.constant 2 : index
    %c0_15 = arith.constant 0 : index
    %c0_16 = arith.constant 0 : index
    %15 = vector.load %arg2[%c2, %c0_15, %c0_16] : memref<4x8x16xf32, #tpu.memory_space<vmem>>, vector<1x8x16xf32>
    %16 = vector.shape_cast %15 : vector<1x8x16xf32> to vector<8x16xf32>
    %c0_17 = arith.constant 0 : index
    %c2_18 = arith.constant 2 : index
    %c0_19 = arith.constant 0 : index
    %c0_20 = arith.constant 0 : index
    %17 = vector.load %arg1[%c0_17, %c2_18, %c0_19, %c0_20] : memref<1x4x16x64xf32, #tpu.memory_space<vmem>>, vector<1x1x16x64xf32>
    %18 = vector.shape_cast %17 : vector<1x1x16x64xf32> to vector<16x64xf32>
    %cst_21 = arith.constant dense<0.000000e+00> : vector<8x64xf32>
    %19 = tpu.matmul %16, %18, %cst_21 {dimension_numbers = #tpu.dot_dimension_numbers<[1], [0], [0], [1], [0, 0, 1, 1], [], []>} : vector<8x16xf32>, vector<16x64xf32>, vector<8x64xf32> -> vector<8x64xf32>
    %20 = vector.broadcast %0 : vector<8x1xf32> to vector<8x64xf32>
    %21 = arith.addf %19, %20 : vector<8x64xf32>
    %c3 = arith.constant 3 : index
    %c0_22 = arith.constant 0 : index
    %c0_23 = arith.constant 0 : index
    %22 = vector.load %arg2[%c3, %c0_22, %c0_23] : memref<4x8x16xf32, #tpu.memory_space<vmem>>, vector<1x8x16xf32>
    %23 = vector.shape_cast %22 : vector<1x8x16xf32> to vector<8x16xf32>
    %c0_24 = arith.constant 0 : index
    %c3_25 = arith.constant 3 : index
    %c0_26 = arith.constant 0 : index
    %c0_27 = arith.constant 0 : index
    %24 = vector.load %arg1[%c0_24, %c3_25, %c0_26, %c0_27] : memref<1x4x16x64xf32, #tpu.memory_space<vmem>>, vector<1x1x16x64xf32>
    %25 = vector.shape_cast %24 : vector<1x1x16x64xf32> to vector<16x64xf32>
    %cst_28 = arith.constant dense<0.000000e+00> : vector<8x64xf32>
    %26 = tpu.matmul %23, %25, %cst_28 {dimension_numbers = #tpu.dot_dimension_numbers<[1], [0], [0], [1], [0, 0, 1, 1], [], []>} : vector<8x16xf32>, vector<16x64xf32>, vector<8x64xf32> -> vector<8x64xf32>
    %27 = vector.broadcast %0 : vector<8x1xf32> to vector<8x64xf32>
    %28 = arith.addf %26, %27 : vector<8x64xf32>
    %cst_29 = arith.constant dense<0.000000e+00> : vector<8xf32>
    %29 = vector.multi_reduction <add>, %7, %cst_29 [1] : vector<8x64xf32> to vector<8xf32>
    %30 = vector.shape_cast %29 : vector<8xf32> to vector<8x1xf32>
    %cst_30 = arith.constant 0.000000e+00 : f32
    %31 = vector.broadcast %cst_30 : f32 to vector<8x1xf32>
    %32 = arith.addf %31, %30 : vector<8x1xf32>
    %cst_31 = arith.constant dense<0.000000e+00> : vector<8xf32>
    %33 = vector.multi_reduction <add>, %14, %cst_31 [1] : vector<8x64xf32> to vector<8xf32>
    %34 = vector.shape_cast %33 : vector<8xf32> to vector<8x1xf32>
    %35 = arith.addf %32, %34 : vector<8x1xf32>
    %cst_32 = arith.constant dense<0.000000e+00> : vector<8xf32>
    %36 = vector.multi_reduction <add>, %21, %cst_32 [1] : vector<8x64xf32> to vector<8xf32>
    %37 = vector.shape_cast %36 : vector<8xf32> to vector<8x1xf32>
    %38 = arith.addf %35, %37 : vector<8x1xf32>
    %cst_33 = arith.constant dense<0.000000e+00> : vector<8xf32>
    %39 = vector.multi_reduction <add>, %28, %cst_33 [1] : vector<8x64xf32> to vector<8xf32>
    %40 = vector.shape_cast %39 : vector<8xf32> to vector<8x1xf32>
    %41 = arith.addf %38, %40 : vector<8x1xf32>
    %cst_34 = arith.constant 3.906250e-03 : f32
    %42 = vector.broadcast %cst_34 : f32 to vector<8x1xf32>
    %43 = arith.mulf %41, %42 : vector<8x1xf32>
    %44 = vector.broadcast %43 : vector<8x1xf32> to vector<8x64xf32>
    %45 = arith.subf %7, %44 : vector<8x64xf32>
    %46 = arith.mulf %45, %45 : vector<8x64xf32>
    %cst_35 = arith.constant dense<0.000000e+00> : vector<8xf32>
    %47 = vector.multi_reduction <add>, %46, %cst_35 [1] : vector<8x64xf32> to vector<8xf32>
    %48 = vector.shape_cast %47 : vector<8xf32> to vector<8x1xf32>
    %cst_36 = arith.constant 0.000000e+00 : f32
    %49 = vector.broadcast %cst_36 : f32 to vector<8x1xf32>
    %50 = arith.addf %49, %48 : vector<8x1xf32>
    %51 = vector.broadcast %43 : vector<8x1xf32> to vector<8x64xf32>
    %52 = arith.subf %14, %51 : vector<8x64xf32>
    %53 = arith.mulf %52, %52 : vector<8x64xf32>
    %cst_37 = arith.constant dense<0.000000e+00> : vector<8xf32>
    %54 = vector.multi_reduction <add>, %53, %cst_37 [1] : vector<8x64xf32> to vector<8xf32>
    %55 = vector.shape_cast %54 : vector<8xf32> to vector<8x1xf32>
    %56 = arith.addf %50, %55 : vector<8x1xf32>
    %57 = vector.broadcast %43 : vector<8x1xf32> to vector<8x64xf32>
    %58 = arith.subf %21, %57 : vector<8x64xf32>
    %59 = arith.mulf %58, %58 : vector<8x64xf32>
    %cst_38 = arith.constant dense<0.000000e+00> : vector<8xf32>
    %60 = vector.multi_reduction <add>, %59, %cst_38 [1] : vector<8x64xf32> to vector<8xf32>
    %61 = vector.shape_cast %60 : vector<8xf32> to vector<8x1xf32>
    %62 = arith.addf %56, %61 : vector<8x1xf32>
    %63 = vector.broadcast %43 : vector<8x1xf32> to vector<8x64xf32>
    %64 = arith.subf %28, %63 : vector<8x64xf32>
    %65 = arith.mulf %64, %64 : vector<8x64xf32>
    %cst_39 = arith.constant dense<0.000000e+00> : vector<8xf32>
    %66 = vector.multi_reduction <add>, %65, %cst_39 [1] : vector<8x64xf32> to vector<8xf32>
    %67 = vector.shape_cast %66 : vector<8xf32> to vector<8x1xf32>
    %68 = arith.addf %62, %67 : vector<8x1xf32>
    %cst_40 = arith.constant 3.906250e-03 : f32
    %69 = vector.broadcast %cst_40 : f32 to vector<8x1xf32>
    %70 = arith.mulf %68, %69 : vector<8x1xf32>
    %cst_41 = arith.constant 9.99999974E-6 : f32
    %71 = vector.broadcast %cst_41 : f32 to vector<8x1xf32>
    %72 = arith.addf %70, %71 : vector<8x1xf32>
    %73 = math.rsqrt %72 : vector<8x1xf32>
    %74 = vector.broadcast %43 : vector<8x1xf32> to vector<8x64xf32>
    %75 = arith.subf %7, %74 : vector<8x64xf32>
    %76 = vector.broadcast %73 : vector<8x1xf32> to vector<8x64xf32>
    %77 = arith.mulf %75, %76 : vector<8x64xf32>
    %cst_42 = arith.constant 0.000000e+00 : f32
    %78 = vector.broadcast %cst_42 : f32 to vector<8x64xf32>
    %79 = arith.maximumf %77, %78 : vector<8x64xf32>
    %c0_43 = arith.constant 0 : index
    %c0_44 = arith.constant 0 : index
    %c0_45 = arith.constant 0 : index
    %c0_46 = arith.constant 0 : index
    %80 = vector.load %arg4[%c0_43, %c0_44, %c0_45, %c0_46] : memref<1x4x8x64xf32, #tpu.memory_space<vmem>>, vector<1x1x8x64xf32>
    %81 = vector.shape_cast %80 : vector<1x1x8x64xf32> to vector<8x64xf32>
    %82 = vector.shape_cast %79 : vector<8x64xf32> to vector<1x1x8x64xf32>
    tpu.vector_store %arg4[%c0_43, %c0_44, %c0_45, %c0_46], %82 {strides = array<i32>} : memref<1x4x8x64xf32, #tpu.memory_space<vmem>>, vector<1x1x8x64xf32>,
    %83 = vector.broadcast %43 : vector<8x1xf32> to vector<8x64xf32>
    %84 = arith.subf %14, %83 : vector<8x64xf32>
    %85 = vector.broadcast %73 : vector<8x1xf32> to vector<8x64xf32>
    %86 = arith.mulf %84, %85 : vector<8x64xf32>
    %cst_47 = arith.constant 0.000000e+00 : f32
    %87 = vector.broadcast %cst_47 : f32 to vector<8x64xf32>
    %88 = arith.maximumf %86, %87 : vector<8x64xf32>
    %c0_48 = arith.constant 0 : index
    %c1_49 = arith.constant 1 : index
    %c0_50 = arith.constant 0 : index
    %c0_51 = arith.constant 0 : index
    %89 = vector.load %arg4[%c0_48, %c1_49, %c0_50, %c0_51] : memref<1x4x8x64xf32, #tpu.memory_space<vmem>>, vector<1x1x8x64xf32>
    %90 = vector.shape_cast %89 : vector<1x1x8x64xf32> to vector<8x64xf32>
    %91 = vector.shape_cast %88 : vector<8x64xf32> to vector<1x1x8x64xf32>
    tpu.vector_store %arg4[%c0_48, %c1_49, %c0_50, %c0_51], %91 {strides = array<i32>} : memref<1x4x8x64xf32, #tpu.memory_space<vmem>>, vector<1x1x8x64xf32>,
    %92 = vector.broadcast %43 : vector<8x1xf32> to vector<8x64xf32>
    %93 = arith.subf %21, %92 : vector<8x64xf32>
    %94 = vector.broadcast %73 : vector<8x1xf32> to vector<8x64xf32>
    %95 = arith.mulf %93, %94 : vector<8x64xf32>
    %cst_52 = arith.constant 0.000000e+00 : f32
    %96 = vector.broadcast %cst_52 : f32 to vector<8x64xf32>
    %97 = arith.maximumf %95, %96 : vector<8x64xf32>
    %c0_53 = arith.constant 0 : index
    %c2_54 = arith.constant 2 : index
    %c0_55 = arith.constant 0 : index
    %c0_56 = arith.constant 0 : index
    %98 = vector.load %arg4[%c0_53, %c2_54, %c0_55, %c0_56] : memref<1x4x8x64xf32, #tpu.memory_space<vmem>>, vector<1x1x8x64xf32>
    %99 = vector.shape_cast %98 : vector<1x1x8x64xf32> to vector<8x64xf32>
    %100 = vector.shape_cast %97 : vector<8x64xf32> to vector<1x1x8x64xf32>
    tpu.vector_store %arg4[%c0_53, %c2_54, %c0_55, %c0_56], %100 {strides = array<i32>} : memref<1x4x8x64xf32, #tpu.memory_space<vmem>>, vector<1x1x8x64xf32>,
    %101 = vector.broadcast %43 : vector<8x1xf32> to vector<8x64xf32>
    %102 = arith.subf %28, %101 : vector<8x64xf32>
    %103 = vector.broadcast %73 : vector<8x1xf32> to vector<8x64xf32>
    %104 = arith.mulf %102, %103 : vector<8x64xf32>
    %cst_57 = arith.constant 0.000000e+00 : f32
    %105 = vector.broadcast %cst_57 : f32 to vector<8x64xf32>
    %106 = arith.maximumf %104, %105 : vector<8x64xf32>
    %c0_58 = arith.constant 0 : index
    %c3_59 = arith.constant 3 : index
    %c0_60 = arith.constant 0 : index
    %c0_61 = arith.constant 0 : index
    %107 = vector.load %arg4[%c0_58, %c3_59, %c0_60, %c0_61] : memref<1x4x8x64xf32, #tpu.memory_space<vmem>>, vector<1x1x8x64xf32>
    %108 = vector.shape_cast %107 : vector<1x1x8x64xf32> to vector<8x64xf32>
    %109 = vector.shape_cast %106 : vector<8x64xf32> to vector<1x1x8x64xf32>
    tpu.vector_store %arg4[%c0_58, %c3_59, %c0_60, %c0_61], %109 {strides = array<i32>} : memref<1x4x8x64xf32, #tpu.memory_space<vmem>>, vector<1x1x8x64xf32>,
    return
  }
  func.func @transform_0(%arg0: i32) -> (i32, i32, i32, i32) {
    %c0_i32 = arith.constant 0 : i32
    %c0_i32_0 = arith.constant 0 : i32
    %c0_i32_1 = arith.constant 0 : i32
    %c0_i32_2 = arith.constant 0 : i32
    return %arg0, %c0_i32, %c0_i32_0, %c0_i32_1 : i32, i32, i32, i32
  }
  func.func @transform_1(%arg0: i32) -> (i32, i32, i32) {
    %c0_i32 = arith.constant 0 : i32
    %c0_i32_0 = arith.constant 0 : i32
    %c0_i32_1 = arith.constant 0 : i32
    %c0_i32_2 = arith.constant 0 : i32
    return %c0_i32, %c0_i32_0, %c0_i32_1 : i32, i32, i32
  }
  func.func @transform_2(%arg0: i32) -> (i32, i32) {
    %c0_i32 = arith.constant 0 : i32
    %c0_i32_0 = arith.constant 0 : i32
    %c0_i32_1 = arith.constant 0 : i32
    return %c0_i32, %c0_i32_0 : i32, i32
  }
  func.func @transform_3(%arg0: i32) -> (i32, i32, i32, i32) {
    %c0_i32 = arith.constant 0 : i32
    %c0_i32_0 = arith.constant 0 : i32
    %c0_i32_1 = arith.constant 0 : i32
    %c0_i32_2 = arith.constant 0 : i32
    return %arg0, %c0_i32, %c0_i32_0, %c0_i32_1 : i32, i32, i32, i32
  }
}

</mosaic_0001>

<bundles_post_ra>
// kernel: unet_up_forward.1
= control target key start
LH: loop header
LB: loop body
LE: loop exit
PB: predicated region body
PF: predicated region fallthrough
CT: control target
= control target key end

     0   :  { %s717_s12 = smov 0   ;;  %s773_s0 = inlined_call_operand.vmem [shape: f32[2,4,16,64], index: 0, kind: input, shape index: {}]   ;;  %s774_s1 = inlined_call_operand.vmem [shape: f32[4,8,16], index: 1, kind: input, shape index: {}]   ;;  %s775_s2 = inlined_call_operand.vmem [shape: f32[8,1], index: 2, kind: input, shape index: {}]   ;;  %s776_s3 = inlined_call_operand.vmem [shape: f32[2,4,8,64], index: 3, kind: output, shape index: {}]  }
   0x1 LB: > { %s603_s13 = sadd.s32 4294967295, %s692_s12   ;;  %p607_p0 = scmp.ge.s32.totalorder %s692_s12, 1  ;;  %s692_s12 = sphi %s717_s12, %s13_s12  }
   0x2   : > { %p137_p1 = scmp.lt.s32.totalorder %s692_s12, 3 }
   0x4   : > { %p138_p2 = pnand %p607_p0, %p137_p1 }
   0x5   : > { %p161_p3 = scmp.lt.s32.totalorder (!%p138_p2), %s603_s13, 1 }
   0x6   : > { %141 = sbr.rel (%p138_p2) target bundleno = 547 (0x223), region = 32 }
   0xb   : > { %v694_v0 = vmov 0.0   ;;  %v171_v1 = vld [vmem:[%s775_s2] sm:$0xff]  ;;  %s778_s13 = smov (!%p161_p3, %s603_s13), 1  ;;  %vm695_vm0 = vmmov 0   ;;  %v696_v2 = vmov 0   ;;  %vm180_vm1 = vcmask 130048  }
   0xc   : > { %644 = vmatprep.subr.mxu0 %v694_v0  ;;  %651 = vmatprep.subr.mxu1 %v694_v0  ;;  %s630_s16 = sshll.u32 %s778_s13, 6  ;;  %v172_v7 = vld [vmem:[%s774_s1] sm:$0xff]  ;;  %v613_v8 = vld [vmem:[%s774_s1 + $0x8] sm:$0xff]  ;;  %v617_v13 = vld [vmem:[%s774_s1 + $0x10] sm:$0xff]  ;;  %vm488_vm2 = vcmask 523264   ;;  %s631_s28 = sshll.u32 %s778_s13, 5 }
   0xd   : > { %648 = vmatprep.mubr.msk.f32.mxu0 %vm695_vm0, %v694_v0  ;;  %655 = vmatprep.mubr.msk.f32.mxu1 %vm695_vm0, %v694_v0  ;;  %s165_s19 = scalar_lea.vmem %s773_s0, %s630_s16  ;;  %v621_v14 = vld [vmem:[%s774_s1 + $0x18] sm:$0xff]  ;;  %s170_s4 = scalar_lea.vmem %s776_s3, %s631_s28 }
   0xe   : > { %683 = vset.pattern.permute.xlu0 %v696_v2  ;;  %v174_v3 = vld [vmem:[%s165_s19 + $0x8] sm:$0xff]  ;;  %v615_v4 = vld [vmem:[%s165_s19 + $0x18] sm:$0xff]  ;;  %v173_v5 = vld [vmem:[%s165_s19] sm:$0xff] }
   0xf   : > { %177 = vperm.xlu0 %683, %v171_v1   ;;  %645 = vmatpush3.msra.mxu0 %v174_v3  ;;  %v614_v6 = vld [vmem:[%s165_s19 + $0x10] sm:$0xff]  ;;  %v619_v9 = vld [vmem:[%s165_s19 + $0x28] sm:$0xff]  ;;  %v623_v10 = vld [vmem:[%s165_s19 + $0x38] sm:$0xff] }
  0x10   : > { %652 = vmatpush3.msra.mxu1 %v615_v4  ;;  %646 = vmatprep.subr.mxu0 %v694_v0  ;;  %v618_v11 = vld [vmem:[%s165_s19 + $0x20] sm:$0xff]  ;;  %v622_v12 = vld [vmem:[%s165_s19 + $0x30] sm:$0xff] }
  0x11   : > { %653 = vmatprep.subr.mxu1 %v694_v0  ;;  %647 = vmatpush3.msra.mxu0 %v173_v5 }
  0x12   : > { %654 = vmatpush3.msra.mxu1 %v614_v6  ;;  %649 = vmatmul.mubr.msk.f32.vlgmr.msra.gmra.mxu0 %vm180_vm1, %v172_v7 }
  0x13   : > { %656 = vmatmul.mubr.msk.f32.vlgmr.msra.gmra.mxu1 %vm180_vm1, %v613_v8  ;;  %658 = vmatprep.subr.mxu0 %v694_v0 }
  0x14   : > { %665 = vmatprep.subr.mxu1 %v694_v0  ;;  %659 = vmatpush3.msra.mxu0 %v619_v9 }
  0x15   : > { %666 = vmatpush3.msra.mxu1 %v623_v10  ;;  %660 = vmatprep.subr.mxu0 %v694_v0 }
  0x16   : > { %667 = vmatprep.subr.mxu1 %v694_v0  ;;  %661 = vmatpush3.msra.mxu0 %v618_v11 }
  0x17   : > { %662 = vmatprep.mubr.msk.f32.mxu0 %vm695_vm0, %v694_v0  ;;  %668 = vmatpush3.msra.mxu1 %v622_v12 }
  0x18   : > { %669 = vmatprep.mubr.msk.f32.mxu1 %vm695_vm0, %v694_v0  ;;  %663 = vmatmul.mubr.msk.f32.vlgmr.msra.gmra.mxu0 %vm180_vm1, %v617_v13 }
  0x19   : > { %670 = vmatmul.mubr.msk.f32.vlgmr.msra.gmra.mxu1 %vm180_vm1, %v621_v14 }
  0x8a   : > { %v178_v15 = vpop.permute.xlu0 %177 }
  0xd2   : > { %v250_v16 = vpop.f32.mrf.mxu0 }
  0xd3   : > { %v328_v17 = vpop.f32.mrf.mxu1  ;;  %v251_v18 = vadd.f32 %v250_v16, %v178_v15 }
  0xd4   : > { %v329_v19 = vadd.f32 %v328_v17, %v178_v15  ;;  %v650_v20 = vpop.f32.mrf.mxu0 }
  0xd5   : > { %v657_v21 = vpop.f32.mrf.mxu1  ;;  %v489_v23 = vsel %vm488_vm2, %v251_v18, 0.0 }
  0xd6   : > { %v493_v22 = vsel %vm488_vm2, %v329_v19, 0.0  ;;  %490 = vadd.xlane.f32.xlu0 %v489_v23 }
  0xd7   : > { %494 = vadd.xlane.f32.xlu1 %v493_v22 }
  0xd8   : > { %v406_v24 = vpop.f32.mrf.mxu0 }
  0xd9   : > { %v484_v25 = vpop.f32.mrf.mxu1  ;;  %v407_v26 = vadd.f32 %v406_v24, %v178_v15 }
  0xda   : > { %v664_v27 = vpop.f32.mrf.mxu0  ;;  %v485_v29 = vadd.f32 %v484_v25, %v178_v15 }
  0xdb   : > { %v671_v28 = vpop.f32.mrf.mxu1  ;;  %v497_v30 = vsel %vm488_vm2, %v407_v26, 0.0 }
  0xdc   : > { %498 = vadd.xlane.f32.xlu1 %v497_v30  ;;  %v501_v31 = vsel %vm488_vm2, %v485_v29, 0.0 }
  0xe0   : > { %502 = vadd.xlane.f32.xlu1 %v501_v31 }
 0x15f   : > { %v491_v33 = vpop.xlane.xlu0 %490 }
 0x160   : > { %v495_v32 = vpop.xlane.xlu1 %494 }
 0x161   : > { %v496_v35 = vadd.f32 %v495_v32, %v491_v33 }
 0x165   : > { %v499_v34 = vpop.xlane.xlu1 %498 }
 0x166   : > { %v500_v36 = vadd.f32 %v499_v34, %v496_v35 }
 0x169   : > { %v503_v37 = vpop.xlane.xlu1 %502 }
 0x16a   : > { %v504_v38 = vadd.f32 %v503_v37, %v500_v36 }
 0x16c   : > { %v505_v39 = vmul.f32 0.00390625, %v504_v38 }
 0x16e   : > { %v506_v40 = vsub.f32 %v251_v18, %v505_v39  ;;  %v512_v41 = vsub.f32 %v329_v19, %v505_v39  ;;  %v518_v45 = vsub.f32 %v407_v26, %v505_v39  ;;  %v524_v48 = vsub.f32 %v485_v29, %v505_v39 }
 0x170   : > { %v507_v42 = vmul.f32 %v506_v40, %v506_v40  ;;  %v513_v44 = vmul.f32 %v512_v41, %v512_v41  ;;  %v519_v47 = vmul.f32 %v518_v45, %v518_v45  ;;  %v525_v50 = vmul.f32 %v524_v48, %v524_v48 }
 0x172   : > { %v508_v43 = vsel %vm488_vm2, %v507_v42, 0.0  ;;  %v514_v46 = vsel %vm488_vm2, %v513_v44, 0.0  ;;  %v520_v49 = vsel %vm488_vm2, %v519_v47, 0.0  ;;  %v526_v51 = vsel %vm488_vm2, %v525_v50, 0.0 }
 0x173   : > { %509 = vadd.xlane.f32.xlu1 %v508_v43 }
 0x177   : > { %515 = vadd.xlane.f32.xlu1 %v514_v46 }
 0x17b   : > { %521 = vadd.xlane.f32.xlu1 %v520_v49 }
 0x17f   : > { %527 = vadd.xlane.f32.xlu1 %v526_v51 }
 0x1fc   : > { %v510_v52 = vpop.xlane.xlu1 %509 }
 0x200   : > { %v516_v53 = vpop.xlane.xlu1 %515 }
 0x201   : > { %v517_v55 = vadd.f32 %v516_v53, %v510_v52 }
 0x204   : > { %v522_v54 = vpop.xlane.xlu1 %521 }
 0x205   : > { %v523_v56 = vadd.f32 %v522_v54, %v517_v55 }
 0x208   : > { %v528_v57 = vpop.xlane.xlu1 %527 }
 0x209   : > { %v529_v58 = vadd.f32 %v528_v57, %v523_v56 }
 0x20b   : > { %v530_v59 = vmul.f32 0.00390625, %v529_v58 }
 0x20d   : > { %v531_v60 = vadd.f32 1e-05, %v530_v59 }
 0x20f   : > { %684 = vrsqrt.f32 %v531_v60 }
 0x21c   : > { %v685_v61 = vpop.eup %684 }
 0x21d   : > { %v533_v62 = vmul.f32 %v685_v61, %v506_v40  ;;  %v536_v63 = vmul.f32 %v685_v61, %v512_v41  ;;  %v540_v0 = vmul.f32 %v685_v61, %v518_v45  ;;  %v544_v1 = vmul.f32 %v685_v61, %v524_v48 }
 0x21f   : > { %v534_v2 = vmax.f32 %v533_v62, 0.0  ;;  %v537_v3 = vmax.f32 %v536_v63, 0.0  ;;  %v541_v4 = vmax.f32 %v540_v0, 0.0  ;;  %v545_v5 = vmax.f32 %v544_v1, 0.0 }
 0x221   : > { %535 = vst.msk [vmem:[%s170_s4] sm:$0xff] %vm488_vm2, %v534_v2  ;;  %625 = vst.msk [vmem:[%s170_s4 + $0x8] sm:$0xff] %vm488_vm2, %v537_v3 }
 0x222   : > { %626 = vst.msk [vmem:[%s170_s4 + $0x10] sm:$0xff] %vm488_vm2, %v541_v4  ;;  %627 = vst.msk [vmem:[%s170_s4 + $0x18] sm:$0xff] %vm488_vm2, %v545_v5 }
 0x223 PF: > { %s13_s12 = sadd.s32 1, %s692_s12  }
 0x224   : > { %p10_p4 = scmp.ge.s32.totalorder %s13_s12, 4  }
 0x226   :  { %12 = sbr.rel (!%p10_p4) target bundleno = 1 (0x1), region = 71 }

</bundles_post_ra>
